<compile_context>
chip_gen: v6e
topology: v6e:2x2x1
jax: 0.10.0
libtpu: 0.0.40
codegen_flags: <defaults>
</compile_context>

<pallas_src>
import functools

import jax
import jax.numpy as jnp
from jax.experimental import pallas as pl
from jax.experimental.pallas import tpu as pltpu

EPS = 1e-6  # matches torch.nn.functional.pairwise_distance default eps


def _contrastive_kernel(x1_ref, x2_ref, y_ref, out_ref, acc_ref, *,
                        margin, batch_size, feat_size, block_rows, block_cols):
    i = pl.program_id(0)   # batch-tile index   ("parallel")
    k = pl.program_id(1)   # feature-tile index ("arbitrary", reduction axis last)

    @pl.when(k == 0)
    def _():
        acc_ref[...] = jnp.zeros_like(acc_ref)

    x1 = x1_ref[...].astype(jnp.float32)          # (TB, TK)
    x2 = x2_ref[...].astype(jnp.float32)          # (TB, TK)
    diff = x1 - x2 + EPS

    # Mask padded feature columns only when D is actually ragged (static gate).
    if feat_size % block_cols != 0:
        col = jax.lax.broadcasted_iota(jnp.int32, diff.shape, 1) + k * block_cols
        diff = jnp.where(col < feat_size, diff, 0.0)

    acc_ref[...] += jnp.sum(diff * diff, axis=1, keepdims=True)   # (TB, 1) partial dist^2

    @pl.when(k == pl.num_programs(1) - 1)
    def _():
        sq = acc_ref[...]                                   # (TB, 1) == dist^2
        y = y_ref[...].astype(jnp.float32)                  # (TB, 1)
        dist = jnp.sqrt(sq)                                 # EUP, cheap
        hinge = jnp.maximum(margin - dist, 0.0)
        total = (1.0 - y) * sq + y * (hinge * hinge)

        # Mask rows past the true batch size only when the last tile is ragged.
        if batch_size % block_rows != 0:
            row = jax.lax.broadcasted_iota(jnp.int32, total.shape, 0) + i * block_rows
            total = jnp.where(row < batch_size, total, 0.0)

        out_ref[0, 0] = jnp.sum(total)   # per-batch-block partial sum -> SMEM


def contrastive_loss(x1, x2, y, margin, *, target_tile_bytes=6 << 20):
    """x1, x2: (B, D) arrays (any float dtype); y: (B,) labels. Returns scalar loss."""
    B, D = x1.shape
    itemsize = jnp.dtype(x1.dtype).itemsize
    b_pad = -(-B // 8) * 8

    # Feature tile: whole D if an 8-row slab of full D fits the per-input target,
    # otherwise a 128-multiple chunk accumulated over the reduction grid axis.
    if 8 * D * itemsize <= target_tile_bytes:
        tk = D
    else:
        tk = max(128, ((target_tile_bytes // (8 * itemsize)) // 128) * 128)
    nk = pl.cdiv(D, tk)

    # Batch tile: ~target bytes per input tile, multiple of 8; capped at 8192 rows so
    # the lane-padded (tb, 1) y/scratch buffers stay a few MiB each.
    tb = max(8, min((target_tile_bytes // max(tk * itemsize, 1)) // 8 * 8, 8192, b_pad))
    # Guarantee >= 2 batch blocks when possible so both v7x TensorCores get work.
    if b_pad >= 16 and tb >= b_pad:
        tb = ((b_pad // 2 + 7) // 8) * 8
    nb = pl.cdiv(B, tb)

    y2d = y.reshape(B, 1).astype(jnp.float32)     # tiny; casting here is free

    kernel = functools.partial(
        _contrastive_kernel, margin=float(margin), batch_size=B, feat_size=D,
        block_rows=tb, block_cols=tk)

    cost = pl.CostEstimate(
        flops=int(3 * B * D + 10 * B),
        transcendentals=int(B),                    # one sqrt per row
        bytes_accessed=int(2 * B * D * itemsize + B * 4 + nb * 4),
    )

    partials = pl.pallas_call(
        kernel,
        out_shape=jax.ShapeDtypeStruct((nb, 1), jnp.float32),
        grid=(nb, nk),
        in_specs=[
            pl.BlockSpec((tb, tk), lambda i, k: (i, k)),
            pl.BlockSpec((tb, tk), lambda i, k: (i, k)),
            pl.BlockSpec((tb, 1), lambda i, k: (i, 0)),
        ],
        out_specs=pl.BlockSpec((1, 1), lambda i, k: (i, 0), memory_space=pltpu.SMEM),
        scratch_shapes=[pltpu.VMEM((tb, 1), jnp.float32)],
        compiler_params=pltpu.CompilerParams(
            dimension_semantics=("parallel", "arbitrary"),
            vmem_limit_bytes=48 * 1024 * 1024,
        ),
        cost_estimate=cost,
    )(x1, x2, y2d)

    # Final tiny reduction in XLA; divide by the true global batch size.
    return jnp.sum(partials) / B


def contrastive_loss_ref(x1, x2, y, margin):
    """Pure-JAX reference mirroring the PyTorch module."""
    diff = x1.astype(jnp.float32) - x2.astype(jnp.float32) + EPS
    dist = jnp.sqrt(jnp.sum(diff * diff, axis=1))
    yf = y.astype(jnp.float32)
    total = (1.0 - yf) * dist**2 + yf * jnp.maximum(margin - dist, 0.0) ** 2
    return jnp.mean(total)


if __name__ == "__main__":
    key = jax.random.PRNGKey(0)
    k1, k2, k3 = jax.random.split(key, 3)

    margin = 2.0

    # Case 1: small aligned batch (single batch block, single feature block).
    B, D = 8, 32
    x1 = jax.random.normal(k1, (B, D), dtype=jnp.float32)
    x2 = jax.random.normal(k2, (B, D), dtype=jnp.float32)
    y = jax.random.bernoulli(k3, 0.5, (B,)).astype(jnp.float32)

    loss = contrastive_loss(x1, x2, y, margin)
    jax.block_until_ready(loss)
    ref = contrastive_loss_ref(x1, x2, y, margin)
    assert jnp.allclose(loss, ref, rtol=1e-4, atol=1e-5), (loss, ref)

    # Case 2: ragged batch (B not a multiple of the block size) exercises the
    # row mask and the >=2-block split for megacore.
    B2, D2 = 10, 32
    k4, k5, k6 = jax.random.split(k3, 3)
    x1b = jax.random.normal(k4, (B2, D2), dtype=jnp.float32)
    x2b = jax.random.normal(k5, (B2, D2), dtype=jnp.float32)
    yb = jax.random.bernoulli(k6, 0.5, (B2,)).astype(jnp.float32)

    loss2 = contrastive_loss(x1b, x2b, yb, margin)
    jax.block_until_ready(loss2)
    ref2 = contrastive_loss_ref(x1b, x2b, yb, margin)
    assert jnp.allclose(loss2, ref2, rtol=1e-4, atol=1e-5), (loss2, ref2)

    # Case 3: bf16 inputs + a tiny tile target to force the feature-dim reduction
    # axis (nk > 1) and multiple batch blocks; exercises the accumulation path.
    B3, D3 = 20, 384
    k7, k8, k9 = jax.random.split(k6, 3)
    x1c = jax.random.normal(k7, (B3, D3), dtype=jnp.bfloat16)
    x2c = jax.random.normal(k8, (B3, D3), dtype=jnp.bfloat16)
    yc = jax.random.bernoulli(k9, 0.5, (B3,)).astype(jnp.float32)

    loss3 = contrastive_loss(x1c, x2c, yc, margin, target_tile_bytes=4096)
    jax.block_until_ready(loss3)
    ref3 = contrastive_loss_ref(x1c, x2c, yc, margin)
    assert jnp.allclose(loss3, ref3, rtol=1e-4, atol=1e-4), (loss3, ref3)

    print("KERNEL_OK")
</pallas_src>

<mosaic_0001>
module attributes {stable_mosaic.version = 11 : i64} {
  func.func @_contrastive_kernel(%arg0: i32, %arg1: i32, %arg2: memref<8x32xf32, #tpu.memory_space<vmem>>, %arg3: memref<8x32xf32, #tpu.memory_space<vmem>>, %arg4: memref<8x1xf32, #tpu.memory_space<vmem>>, %arg5: memref<1x1xf32, #tpu.memory_space<smem>>, %arg6: memref<8x1xf32, #tpu.memory_space<vmem>>) attributes {dimension_semantics = [#tpu.dimension_semantics<parallel>, #tpu.dimension_semantics<arbitrary>], iteration_bounds = array<i64: 1, 1>, scalar_prefetch = 0 : i64, scratch_operands = 1 : i64, tpu.core_type = #tpu.core_type<tc>, window_params = [{transform_indices = @transform_0, window_bounds = array<i64: 8, 32>}, {transform_indices = @transform_1, window_bounds = array<i64: 8, 32>}, {transform_indices = @transform_2, window_bounds = array<i64: 8, 1>}, {transform_indices = @transform_3, window_bounds = array<i64: 1, 1>}]} {
    %c0_i32 = arith.constant 0 : i32
    %0 = arith.cmpi eq, %arg1, %c0_i32 : i32
    %1 = arith.extui %0 : i1 to i32
    %c0_i32_0 = arith.constant 0 : i32
    %2 = arith.cmpi ne, %1, %c0_i32_0 : i32
    scf.if %2 {
      %cst_11 = arith.constant 0.000000e+00 : f32
      %17 = vector.broadcast %cst_11 : f32 to vector<8x1xf32>
      %c0_12 = arith.constant 0 : index
      %c0_13 = arith.constant 0 : index
      %18 = vector.load %arg6[%c0_12, %c0_13] : memref<8x1xf32, #tpu.memory_space<vmem>>, vector<8x1xf32>
      tpu.vector_store %arg6[%c0_12, %c0_13], %17 {strides = array<i32>} : memref<8x1xf32, #tpu.memory_space<vmem>>, vector<8x1xf32>,
    } else {
    }
    %c0 = arith.constant 0 : index
    %c0_1 = arith.constant 0 : index
    %3 = vector.load %arg2[%c0, %c0_1] : memref<8x32xf32, #tpu.memory_space<vmem>>, vector<8x32xf32>
    %c0_2 = arith.constant 0 : index
    %c0_3 = arith.constant 0 : index
    %4 = vector.load %arg3[%c0_2, %c0_3] : memref<8x32xf32, #tpu.memory_space<vmem>>, vector<8x32xf32>
    %5 = arith.subf %3, %4 : vector<8x32xf32>
    %cst = arith.constant 9.99999997E-7 : f32
    %6 = vector.broadcast %cst : f32 to vector<8x32xf32>
    %7 = arith.addf %5, %6 : vector<8x32xf32>
    %c0_4 = arith.constant 0 : index
    %c0_5 = arith.constant 0 : index
    %8 = vector.load %arg6[%c0_4, %c0_5] : memref<8x1xf32, #tpu.memory_space<vmem>>, vector<8x1xf32>
    %9 = arith.mulf %7, %7 : vector<8x32xf32>
    %cst_6 = arith.constant dense<0.000000e+00> : vector<8xf32>
    %10 = vector.multi_reduction <add>, %9, %cst_6 [1] : vector<8x32xf32> to vector<8xf32>
    %11 = vector.shape_cast %10 : vector<8xf32> to vector<8x1xf32>
    %12 = arith.addf %8, %11 : vector<8x1xf32>
    %c0_7 = arith.constant 0 : index
    %c0_8 = arith.constant 0 : index
    %13 = vector.load %arg6[%c0_7, %c0_8] : memref<8x1xf32, #tpu.memory_space<vmem>>, vector<8x1xf32>
    tpu.vector_store %arg6[%c0_7, %c0_8], %12 {strides = array<i32>} : memref<8x1xf32, #tpu.memory_space<vmem>>, vector<8x1xf32>,
    %c0_i32_9 = arith.constant 0 : i32
    %14 = arith.cmpi eq, %arg1, %c0_i32_9 : i32
    %15 = arith.extui %14 : i1 to i32
    %c0_i32_10 = arith.constant 0 : i32
    %16 = arith.cmpi ne, %15, %c0_i32_10 : i32
    scf.if %16 {
      %c0_11 = arith.constant 0 : index
      %c0_12 = arith.constant 0 : index
      %17 = vector.load %arg6[%c0_11, %c0_12] : memref<8x1xf32, #tpu.memory_space<vmem>>, vector<8x1xf32>
      %c0_13 = arith.constant 0 : index
      %c0_14 = arith.constant 0 : index
      %18 = vector.load %arg4[%c0_13, %c0_14] : memref<8x1xf32, #tpu.memory_space<vmem>>, vector<8x1xf32>
      %19 = math.sqrt %17 : vector<8x1xf32>
      %cst_15 = arith.constant 2.000000e+00 : f32
      %20 = vector.broadcast %cst_15 : f32 to vector<8x1xf32>
      %21 = arith.subf %20, %19 : vector<8x1xf32>
      %cst_16 = arith.constant 0.000000e+00 : f32
      %22 = vector.broadcast %cst_16 : f32 to vector<8x1xf32>
      %23 = arith.maximumf %21, %22 : vector<8x1xf32>
      %cst_17 = arith.constant 1.000000e+00 : f32
      %24 = vector.broadcast %cst_17 : f32 to vector<8x1xf32>
      %25 = arith.subf %24, %18 : vector<8x1xf32>
      %26 = arith.mulf %25, %17 : vector<8x1xf32>
      %27 = arith.mulf %23, %23 : vector<8x1xf32>
      %28 = arith.mulf %18, %27 : vector<8x1xf32>
      %29 = arith.addf %26, %28 : vector<8x1xf32>
      %30 = vector.shape_cast %29 : vector<8x1xf32> to vector<1x8x1xf32>
      %cst_18 = arith.constant dense<0.000000e+00> : vector<1xf32>
      %31 = vector.multi_reduction <add>, %30, %cst_18 [1, 2] : vector<1x8x1xf32> to vector<1xf32>
      %32 = vector.shape_cast %31 : vector<1xf32> to vector<1x1x1xf32>
      %33 = vector.extract %32[0, 0, 0] : f32 from vector<1x1x1xf32>
      %c0_19 = arith.constant 0 : index
      %c0_20 = arith.constant 0 : index
      %34 = memref.load %arg5[%c0_19, %c0_20] : memref<1x1xf32, #tpu.memory_space<smem>>
      memref.store %33, %arg5[%c0_19, %c0_20] : memref<1x1xf32, #tpu.memory_space<smem>>
    } else {
    }
    return
  }
  func.func @transform_0(%arg0: i32, %arg1: i32) -> (i32, i32) {
    %c0_i32 = arith.constant 0 : i32
    return %arg0, %arg1 : i32, i32
  }
  func.func @transform_1(%arg0: i32, %arg1: i32) -> (i32, i32) {
    %c0_i32 = arith.constant 0 : i32
    return %arg0, %arg1 : i32, i32
  }
  func.func @transform_2(%arg0: i32, %arg1: i32) -> (i32, i32) {
    %c0_i32 = arith.constant 0 : i32
    %c0_i32_0 = arith.constant 0 : i32
    return %arg0, %c0_i32 : i32, i32
  }
  func.func @transform_3(%arg0: i32, %arg1: i32) -> (i32, i32) {
    %c0_i32 = arith.constant 0 : i32
    %c0_i32_0 = arith.constant 0 : i32
    return %arg0, %c0_i32 : i32, i32
  }
}

</mosaic_0001>

<bundles_post_ra>
// kernel: tpu_custom_call.1
= control target key start
LH: loop header
LB: loop body
LE: loop exit
PB: predicated region body
PF: predicated region fallthrough
CT: control target
= control target key end

     0   :  { %8 = vsyncpa [#allocation4], 0  ;;  %s168_s0 = inlined_call_operand.vmem [shape: f32[8,32], index: 0, kind: input, shape index: {}]   ;;  %s169_s1 = inlined_call_operand.hbm [shape: f32[8,32], index: 1, kind: input, shape index: {}]   ;;  %s170_s2 = inlined_call_operand.vmem [shape: f32[8,1], index: 2, kind: input, shape index: {}]   ;;  %s171_s3 = inlined_call_operand.hbm [shape: f32[1,1], index: 3, kind: output, shape index: {}]  }
   0x1   :  { %9 = vsyncpa [#allocation5], 0  ;;  %s130_s12 = smov [#allocation3]  }
   0x2   :  { %s18_s13 = sshll.u32 %s130_s12, 4  ;;  %s19_s13 = int_to_ptr.vmem [resolvable:$true] %s18_s13 }
   0x3   :  { %s106_s14 = scalar_lea.vmem %s19_s13, 128  ;;  %p111_p1 = scmp.lt.s32.totalorder %s19_s13, %s19_s13 }
   0x4   :  { %p107_p0 = scmp.ne.s32.totalorder %s19_s13, %s106_s14  ;;  %p112_p2 = scmp.lt.s32.totalorder %s106_s14, %s106_s14 }
   0x6   :  { %p113_p3 = por %p112_p2, %p111_p1 }
   0x8   :  { %p114_p4 = pnand %p113_p3, %p107_p0 }
   0xa   :  { %117 = shalt.err (!%p114_p4)
}
   0xb   :  { %21 = dma.hbm_to_vmem [thread:$0]  %s169_s1, 128, %s19_s13, [#allocation4]  }
   0xc   :  { %126 = dma.done.wait [#allocation4], 128  }
   0xd   :  { %127 = vsyncadd [#allocation4], 4294967168  ;;  %vm31_vm0 = vcmask 7168   ;;  %v131_v0 = vmov 0.0   ;;  %v33_v1 = vld [vmem:[%s168_s0] sm:$0xff]  ;;  %v34_v2 = vld [vmem:[#allocation3] sm:$0xff] }
   0xe   :  { %32 = vst.msk [vmem:[#allocation2] sm:$0xff] %vm31_vm0, %v131_v0  ;;  %v35_v3 = vsub.f32 %v33_v1, %v34_v2  ;;  %vm39_vm1 = vcmask 261120   ;;  %v50_v15 = vld [vmem:[%s170_s2] sm:$0xff]  ;;  %s132_s19 = smov [#allocation6]  }
   0xf   :  { %v60_v19 = vsub.f32 1.0, %v50_v15 }
  0x10   :  { %v36_v4 = vadd.f32 1e-06, %v35_v3 }
  0x12   :  { %v38_v5 = vmul.f32 %v36_v4, %v36_v4 }
  0x14   :  { %v40_v6 = vsel %vm39_vm1, %v38_v5, 0.0 }
  0x15   :  { %41 = vadd.xlane.f32.xlu0 %v40_v6  ;;  %v37_v7 = vld [vmem:[#allocation2] sm:$0xff] }
  0x9e   :  { %v42_v8 = vpop.xlane.xlu0 %41 }
  0x9f   :  { %v43_v9 = vadd.f32 %v42_v8, %v37_v7 }
  0xa1   :  { %45 = vst.msk [vmem:[#allocation2] sm:$0xff] %vm31_vm0, %v43_v9 }
  0xa8   :  { %v49_v10 = vld [vmem:[#allocation2] sm:$0xff] }
  0xa9   :  { %96 = vrsqrt.f32 %v49_v10  ;;  %vm53_vm2 = vcmp.eq.f32.partialorder %v49_v10, inf  ;;  %v56_v13 = vand.u32 2147483648, %v49_v10  ;;  %vm55_vm3 = vcmp.eq.f32.partialorder %v49_v10, 0.0 }
  0xaa   :  { %v61_v21 = vmul.f32 %v60_v19, %v49_v10 }
  0xb6   :  { %v97_v11 = vpop.eup %96 }
  0xb7   :  { %v52_v12 = vmul.f32 %v97_v11, %v49_v10 }
  0xb9   :  { %v54_v14 = vsel %vm53_vm2, %v49_v10, %v52_v12 }
  0xba   :  { %v57_v16 = vsel %vm55_vm3, %v56_v13, %v54_v14 }
  0xbb   :  { %v58_v17 = vsub.f32 2.0, %v57_v16 }
  0xbd   :  { %v59_v18 = vmax.f32 %v58_v17, 0.0 }
  0xbf   :  { %v62_v20 = vmul.f32 %v59_v18, %v59_v18 }
  0xc1   :  { %v63_v22 = vmul.f32 %v62_v20, %v50_v15 }
  0xc3   :  { %v64_v23 = vadd.f32 %v63_v22, %v61_v21 }
  0xc5   :  { %v65_v24 = vsel %vm31_vm0, %v64_v23, 0.0 }
  0xc6   :  { %66 = vadd.xlane.f32.xlu0 %v65_v24 }
 0x14f   :  { %v67_v25 = vpop.xlane.xlu0 %66 }
 0x150   :  { %v68_v26 = vrot.slane %v67_v25, 4 }
 0x152   :  { %v69_v27 = vadd.f32 %v68_v26, %v67_v25 }
 0x154   :  { %v70_v28 = vrot.slane %v69_v27, 2 }
 0x156   :  { %v71_v29 = vadd.f32 %v70_v28, %v69_v27 }
 0x158   :  { %v72_v30 = vrot.slane %v71_v29, 1 }
 0x15a   :  { %v73_v31 = vadd.f32 %v72_v30, %v71_v29 }
 0x15c   :  { %91 = vpush %v73_v31 }
 0x18d   :  { %s92_s2 = spop %91 }
 0x18e   :  { %76 = sst [smem:[#allocation6]] %s92_s2 }
 0x18f   :  { %84 = dma.smem_to_hbm %s132_s19, 16, %s171_s3, [#allocation5]  }
 0x190   :  { %128 = dma.done.wait [#allocation5], 16  }
 0x191   :  { %129 = vsyncadd [#allocation5], 4294967280 }
 0x192   :  { %88 = sfence }
 0x193   :  { %89 = vsyncpa [#allocation4], 1 }
 0x194   :  { %90 = vsyncpa [#allocation5], 1 }

</bundles_post_ra>
